<compile_context>
chip_gen: v7x
topology: tpu7x:2x2x1
jax: 0.10.0
libtpu: 0.0.40
codegen_flags: <defaults>
</compile_context>

<pallas_src>
import functools
import math

import jax
import jax.numpy as jnp
import numpy as np
from jax.experimental import pallas as pl
from jax.experimental.pallas import tpu as pltpu


def _fda_kernel(x_ref, w_ref, init_ref, gamma_ref, beta_ref, out_ref, *,
                H, K, L_out, taps, scale, eps, compute_dtype, approx_recip):
    cdt = compute_dtype
    Bt, _, C = init_ref.shape
    d = C // H
    BH = Bt * H

    w = w_ref[...]                    # tiny: (3,K,H,d,d) taps / (3,H,d,d*K) im2col

    def rep(a):
        # Replicate a per-head tensor (H, m, n) across the Bt batch rows of this
        # block -> (Bt*H, m, n).  Broadcast over a new leading dim + leading-dim
        # merge leave the last two (tiled) dims untouched, so no vreg relayout.
        return jnp.broadcast_to(a[None], (Bt,) + a.shape).reshape((BH,) + a.shape[1:])

    if taps:
        # stride == 1: no im2col stream; the K taps are static lane shifts of the
        # raw (d, L) rows, each contracted with its own (d, d) tap weight.
        x = x_ref[...].reshape(BH, d, x_ref.shape[-1])            # (BH, d, L)
        q = k = v = None
        for kk in range(K):                                       # K small, static
            xs = x[..., kk:kk + L_out]                            # (BH, d, L_out)
            tq = jnp.einsum('Bdc,Bcl->Bdl', rep(w[0, kk]), xs,
                            preferred_element_type=jnp.float32)
            tk = jnp.einsum('Bdc,Bcl->Bdl', rep(w[1, kk]), xs,
                            preferred_element_type=jnp.float32)
            tv = jnp.einsum('Bdc,Bcl->Bdl', rep(w[2, kk]), xs,
                            preferred_element_type=jnp.float32)
            q = tq if q is None else q + tq
            k = tk if k is None else k + tk
            v = tv if v is None else v + tv
    else:
        # stride > 1: wrapper-side im2col; each projection is one batched matmul.
        xu = x_ref[...]
        xu = xu.reshape(BH, xu.shape[2], L_out)                   # (BH, d*K, L_out)
        q = jnp.einsum('Bde,Bel->Bdl', rep(w[0]), xu,
                       preferred_element_type=jnp.float32)
        k = jnp.einsum('Bde,Bel->Bdl', rep(w[1]), xu,
                       preferred_element_type=jnp.float32)
        v = jnp.einsum('Bde,Bel->Bdl', rep(w[2]), xu,
                       preferred_element_type=jnp.float32)

    # 1/sqrt(H) applied to q post-accumulation in f32 (exact; keeps bf16 weights
    # unperturbed -- addresses the numerics concern about folding the scale).
    q = q * scale

    # attention logits + softmax in f32; reciprocal rides the EUP slot.
    attn = jnp.einsum('Bdl,Bdm->Blm', q.astype(cdt), k.astype(cdt),
                      preferred_element_type=jnp.float32)         # (BH, L, L)
    attn = attn - jnp.max(attn, axis=-1, keepdims=True)
    p = jnp.exp(attn)
    denom = jnp.sum(p, axis=-1, keepdims=True)
    p = p * pl.reciprocal(denom, approx=approx_recip)

    o = jnp.einsum('Blm,Bdm->Bld', p.astype(cdt), v.astype(cdt),
                   preferred_element_type=jnp.float32)            # (BH, L, d)

    # heads -> feature axis, once per block (previously once per batch row).
    o = o.reshape(Bt, H, L_out, d)
    o = jnp.concatenate([o[:, h] for h in range(H)], axis=-1)     # (Bt, L, C)

    # residual + LayerNorm(C) over the whole block; gamma/beta broadcast once.
    feat = o + init_ref[...]
    mean = jnp.mean(feat, axis=-1, keepdims=True)
    var = jnp.mean((feat - mean) ** 2, axis=-1, keepdims=True)
    normed = (feat - mean) * jax.lax.rsqrt(var + eps)
    out_ref[...] = (normed * gamma_ref[...] + beta_ref[...]).astype(out_ref.dtype)


def _vmem_capacity_bytes():
    # Chip-aware VMEM budget (v7x: 64 MiB/TC, v5e/v6e: 128 MiB).
    try:
        cap = int(pltpu.get_tpu_info().vmem_capacity_bytes)
        if cap > 0:
            return cap
    except Exception:
        pass
    return 64 << 20   # conservative fallback: assume v7x-class per-core VMEM


def _pick_block_batch(B, stream_bytes_per_b, live_bytes_per_b, vmem_cap):
    """Batch elements per grid step.

    v7x-class (small VMEM, 2 TCs): keep Bt small (<=4) and >=4 grid steps so both
    TensorCores get pipelined work.  v5e/v6e (single TC, 128 MiB): grow Bt for
    big, lane/DMA-efficient tiles and keep only >=2 steps for DMA/compute overlap.
    """
    small_vmem = vmem_cap <= (96 << 20)
    budget = int(0.40 * vmem_cap)        # headroom for double-buffers + scratch
    min_steps = 4 if small_vmem else 2
    hard_cap = 4 if small_vmem else B
    best = 1
    for bt in range(1, B + 1):           # divisors ascending; constraints monotone
        if B % bt:
            continue
        if bt > hard_cap:
            break
        if (B // bt) < min(min_steps, B):
            break
        if bt * (2 * stream_bytes_per_b + live_bytes_per_b) > budget:
            break
        best = bt
    return best


def former_decoder_attention(x, init_weight, wq, wk, wv, gamma, beta, *,
                             multihead_num, kernel_size, stride, eps=1e-5,
                             compute_dtype=jnp.bfloat16, approx_reciprocal=True,
                             block_batch=None):
    B, C, L = x.shape
    H = multihead_num
    d = C // H
    K = kernel_size
    L_out = (L - K) // stride + 1
    dK = d * K
    scale = 1.0 / math.sqrt(H)
    cdt = compute_dtype
    item = jnp.dtype(cdt).itemsize
    taps = (stride == 1)

    # ---------- wrapper-side layout plumbing (XLA; free for the kernel) ----------
    if taps:
        # raw input stream (no K-times im2col inflation); weights per tap.
        x_in = x.reshape(B, H, d, L).astype(cdt)                            # (B,H,d,L)

        def _w(w):  # (C, d_in, K) -> (K, H, d_out, d_in)
            return jnp.transpose(w.reshape(H, d, d, K), (3, 0, 1, 2))
        w_all = jnp.stack([_w(wq), _w(wk), _w(wv)], axis=0).astype(cdt)     # (3,K,H,d,d)
        x_spec = pl.BlockSpec((None, H, d, L), lambda i: (i, 0, 0, 0))
        w_spec = pl.BlockSpec((3, K, H, d, d), lambda i: (0, 0, 0, 0, 0))
        x_bytes_per_b = H * d * L * item
    else:
        # im2col / unfold once: xu[b,h, ci*K+kk, t] = x[b, h*d+ci, t*stride+kk]
        xh = x.reshape(B, H, d, L)
        idx = (jnp.arange(L_out) * stride)[:, None] + jnp.arange(K)[None, :]
        x_unf = jnp.transpose(xh[:, :, :, idx], (0, 1, 2, 4, 3))            # (B,H,d,K,Lo)
        x_in = x_unf.reshape(B, H, dK, L_out).astype(cdt)                   # (B,H,dK,Lo)

        def _w(w):  # (C, d_in, K) -> (H, d_out, d_in*K)
            return w.reshape(H, d, dK)
        w_all = jnp.stack([_w(wq), _w(wk), _w(wv)], axis=0).astype(cdt)     # (3,H,d,dK)
        x_spec = pl.BlockSpec((None, H, dK, L_out), lambda i: (i, 0, 0, 0))
        w_spec = pl.BlockSpec((3, H, d, dK), lambda i: (0, 0, 0, 0))
        x_bytes_per_b = H * dK * L_out * item

    init_t = jnp.transpose(init_weight, (0, 2, 1)).astype(jnp.float32)      # (B,Lo,C)
    gamma2 = gamma.reshape(1, C).astype(jnp.float32)
    beta2 = beta.reshape(1, C).astype(jnp.float32)

    # ---------- chip-aware block-batch + VMEM budget ----------
    io_bytes_per_b = 2 * L_out * C * 4                         # residual in + out (f32)
    stream_b = x_bytes_per_b + io_bytes_per_b
    live_b = 4 * (3 * H * L_out * d                            # q,k,v (f32)
                  + 2 * H * L_out * L_out                      # logits + probs (f32)
                  + 4 * L_out * C)                             # o / concat / feat / norm
    vmem_cap = _vmem_capacity_bytes()
    Bt = (_pick_block_batch(B, stream_b, live_b, vmem_cap)
          if block_batch is None else block_batch)
    assert B % Bt == 0, "block_batch must divide batch"
    w_bytes = int(np.prod(w_all.shape)) * item
    need = Bt * (2 * stream_b + live_b) + 2 * w_bytes
    vmem_limit = int(min(0.9 * vmem_cap, max(64 << 20, 3 * need)))  # never < default

    # Pallas requires x_spec block leading dim as int, not None-with-squeeze here:
    x_spec = (pl.BlockSpec((Bt, H, d, L), lambda i: (i, 0, 0, 0)) if taps
              else pl.BlockSpec((Bt, H, dK, L_out), lambda i: (i, 0, 0, 0)))

    kernel = functools.partial(
        _fda_kernel, H=H, K=K, L_out=L_out, taps=taps, scale=scale, eps=eps,
        compute_dtype=cdt, approx_recip=approx_reciprocal)

    return pl.pallas_call(
        kernel,
        out_shape=jax.ShapeDtypeStruct((B, L_out, C), jnp.float32),
        grid_spec=pltpu.PrefetchScalarGridSpec(
            num_scalar_prefetch=0,
            grid=(B // Bt,),
            in_specs=[
                x_spec,                                                   # x / xu
                w_spec,                                                   # q/k/v weights
                pl.BlockSpec((Bt, L_out, C), lambda i: (i, 0, 0)),        # residual
                pl.BlockSpec((1, C), lambda i: (0, 0)),                   # gamma
                pl.BlockSpec((1, C), lambda i: (0, 0)),                   # beta
            ],
            out_specs=pl.BlockSpec((Bt, L_out, C), lambda i: (i, 0, 0)),
        ),
        compiler_params=pltpu.CompilerParams(
            dimension_semantics=("parallel",),
            vmem_limit_bytes=vmem_limit),
    )(x_in, w_all, init_t, gamma2, beta2)


def _reference(x, init_weight, wq, wk, wv, gamma, beta,
               *, multihead_num, kernel_size, stride, eps=1e-5):
    """Pure-JAX reference mirroring the PyTorch forward (dropout p=0, mask=None)."""
    B, C, L = x.shape
    H = multihead_num
    d = C // H
    dn = jax.lax.conv_dimension_numbers(x.shape, wq.shape, ('NCH', 'OIH', 'NCH'))

    def gconv(w):
        return jax.lax.conv_general_dilated(
            x, w, (stride,), 'VALID', dimension_numbers=dn,
            feature_group_count=H)

    q, k, v = gconv(wq), gconv(wk), gconv(wv)          # (B, C, L_out)
    L_out = q.shape[-1]
    qh = q.reshape(B, H, d, L_out)
    kh = k.reshape(B, H, d, L_out)
    vh = v.reshape(B, H, d, L_out)
    attn = jnp.einsum('bhdl,bhdm->bhlm', qh, kh) / jnp.sqrt(jnp.float32(H))
    attn = jax.nn.softmax(attn, axis=-1)
    o = jnp.einsum('bhlm,bhdm->bhld', attn, vh)        # (B, H, L_out, d)
    o = jnp.transpose(o, (0, 2, 1, 3)).reshape(B, L_out, C)
    feat = o + jnp.transpose(init_weight, (0, 2, 1))
    mean = jnp.mean(feat, axis=-1, keepdims=True)
    var = jnp.mean((feat - mean) ** 2, axis=-1, keepdims=True)
    return (feat - mean) / jnp.sqrt(var + eps) * gamma + beta


if __name__ == "__main__":
    def run_case(*, B, C, H, L, K, stride, case, compute_dtype,
                 approx_reciprocal, tol):
        d = C // H
        L_out = (L - K) // stride + 1
        key = jax.random.fold_in(jax.random.PRNGKey(0), case)
        kx, ki, kq, kk_, kv = jax.random.split(key, 5)

        x = jax.random.normal(kx, (B, C, L), dtype=jnp.float32)
        init_weight = jax.random.normal(ki, (B, C, L_out), dtype=jnp.float32)
        # matches init_params(): std = sqrt(2 / (C_out + C_in_per_group))
        std = math.sqrt(2.0 / (C + d))
        wq = std * jax.random.normal(kq, (C, d, K), dtype=jnp.float32)
        wk = std * jax.random.normal(kk_, (C, d, K), dtype=jnp.float32)
        wv = std * jax.random.normal(kv, (C, d, K), dtype=jnp.float32)
        gamma = jnp.ones((C,), jnp.float32)   # torch LayerNorm defaults
        beta = jnp.zeros((C,), jnp.float32)

        out = jax.block_until_ready(former_decoder_attention(
            x, init_weight, wq, wk, wv, gamma, beta,
            multihead_num=H, kernel_size=K, stride=stride,
            compute_dtype=compute_dtype, approx_reciprocal=approx_reciprocal))
        ref = jax.block_until_ready(_reference(
            x, init_weight, wq, wk, wv, gamma, beta,
            multihead_num=H, kernel_size=K, stride=stride))
        np.testing.assert_allclose(np.asarray(out), np.asarray(ref),
                                   rtol=tol, atol=tol)

    # 1) stride=1 taps path, f32, exact reciprocal: tight validation.
    run_case(B=4, C=32, H=4, L=16, K=3, stride=1, case=0,
             compute_dtype=jnp.float32, approx_reciprocal=False, tol=1e-3)
    # 2) stride=2 im2col path, f32 + approx reciprocal, B=6 exercises Bt>2.
    run_case(B=6, C=16, H=2, L=20, K=5, stride=2, case=1,
             compute_dtype=jnp.float32, approx_reciprocal=True, tol=1e-2)
    # 3) stride=1 taps path, bf16 matmul inputs with f32 accumulation, loose tol.
    run_case(B=4, C=32, H=4, L=16, K=3, stride=1, case=2,
             compute_dtype=jnp.bfloat16, approx_reciprocal=True, tol=1.5e-1)

    print("KERNEL_OK")
</pallas_src>

<mosaic_0001>
module attributes {stable_mosaic.version = 11 : i64} {
  func.func @_fda_kernel(%arg0: i32, %arg1: memref<1x4x8x16xf32, #tpu.memory_space<vmem>>, %arg2: memref<3x3x4x8x8xf32, #tpu.memory_space<vmem>>, %arg3: memref<1x14x32xf32, #tpu.memory_space<vmem>>, %arg4: memref<1x32xf32, #tpu.memory_space<vmem>>, %arg5: memref<1x32xf32, #tpu.memory_space<vmem>>, %arg6: memref<1x14x32xf32, #tpu.memory_space<vmem>>) attributes {dimension_semantics = [#tpu.dimension_semantics<parallel>], iteration_bounds = array<i64: 4>, scalar_prefetch = 0 : i64, scratch_operands = 0 : i64, tpu.core_type = #tpu.core_type<tc>, window_params = [{transform_indices = @transform_0, window_bounds = array<i64: 1, 4, 8, 16>}, {pipeline_mode = #tpu.pipeline_mode<synchronous>, transform_indices = @transform_1, window_bounds = array<i64: 3, 3, 4, 8, 8>}, {transform_indices = @transform_2, window_bounds = array<i64: 1, 14, 32>}, {pipeline_mode = #tpu.pipeline_mode<synchronous>, transform_indices = @transform_3, window_bounds = array<i64: 1, 32>}, {pipeline_mode = #tpu.pipeline_mode<synchronous>, transform_indices = @transform_4, window_bounds = array<i64: 1, 32>}, {transform_indices = @transform_5, window_bounds = array<i64: 1, 14, 32>}]} {
    %c0 = arith.constant 0 : index
    %c0_0 = arith.constant 0 : index
    %c0_1 = arith.constant 0 : index
    %c0_2 = arith.constant 0 : index
    %c0_3 = arith.constant 0 : index
    %0 = vector.load %arg2[%c0, %c0_0, %c0_1, %c0_2, %c0_3] : memref<3x3x4x8x8xf32, #tpu.memory_space<vmem>>, vector<3x3x4x8x8xf32>
    %c0_4 = arith.constant 0 : index
    %c0_5 = arith.constant 0 : index
    %c0_6 = arith.constant 0 : index
    %c0_7 = arith.constant 0 : index
    %1 = vector.load %arg1[%c0_4, %c0_5, %c0_6, %c0_7] : memref<1x4x8x16xf32, #tpu.memory_space<vmem>>, vector<1x4x8x16xf32>
    %2 = vector.shape_cast %1 : vector<1x4x8x16xf32> to vector<4x8x16xf32>
    %3 = vector.extract_strided_slice %2 {offsets = [0, 0, 0], sizes = [4, 8, 14], strides = [1, 1, 1]} : vector<4x8x16xf32> to vector<4x8x14xf32>
    %4 = vector.extract_strided_slice %0 {offsets = [0, 0, 0, 0, 0], sizes = [1, 1, 4, 8, 8], strides = [1, 1, 1, 1, 1]} : vector<3x3x4x8x8xf32> to vector<1x1x4x8x8xf32>
    %5 = vector.shape_cast %4 : vector<1x1x4x8x8xf32> to vector<4x8x8xf32>
    %6 = vector.shape_cast %5 : vector<4x8x8xf32> to vector<1x4x8x8xf32>
    %7 = vector.shape_cast %6 : vector<1x4x8x8xf32> to vector<4x8x8xf32>
    "tpu.trace_start"() <{level = 10 : i32, message = "Bdc,Bcl->Bdl"}> : () -> ()
    %cst = arith.constant dense<0.000000e+00> : vector<4x8x14xf32>
    %8 = tpu.matmul %7, %3, %cst {dimension_numbers = #tpu.dot_dimension_numbers<[2], [1], [1], [2], [0, 0, 0, 1, 1, 2], [0], [0]>} : vector<4x8x8xf32>, vector<4x8x14xf32>, vector<4x8x14xf32> -> vector<4x8x14xf32>
    "tpu.trace_stop"() : () -> ()
    %9 = vector.extract_strided_slice %0 {offsets = [1, 0, 0, 0, 0], sizes = [1, 1, 4, 8, 8], strides = [1, 1, 1, 1, 1]} : vector<3x3x4x8x8xf32> to vector<1x1x4x8x8xf32>
    %10 = vector.shape_cast %9 : vector<1x1x4x8x8xf32> to vector<4x8x8xf32>
    %11 = vector.shape_cast %10 : vector<4x8x8xf32> to vector<1x4x8x8xf32>
    %12 = vector.shape_cast %11 : vector<1x4x8x8xf32> to vector<4x8x8xf32>
    "tpu.trace_start"() <{level = 10 : i32, message = "Bdc,Bcl->Bdl"}> : () -> ()
    %cst_8 = arith.constant dense<0.000000e+00> : vector<4x8x14xf32>
    %13 = tpu.matmul %12, %3, %cst_8 {dimension_numbers = #tpu.dot_dimension_numbers<[2], [1], [1], [2], [0, 0, 0, 1, 1, 2], [0], [0]>} : vector<4x8x8xf32>, vector<4x8x14xf32>, vector<4x8x14xf32> -> vector<4x8x14xf32>
    "tpu.trace_stop"() : () -> ()
    %14 = vector.extract_strided_slice %0 {offsets = [2, 0, 0, 0, 0], sizes = [1, 1, 4, 8, 8], strides = [1, 1, 1, 1, 1]} : vector<3x3x4x8x8xf32> to vector<1x1x4x8x8xf32>
    %15 = vector.shape_cast %14 : vector<1x1x4x8x8xf32> to vector<4x8x8xf32>
    %16 = vector.shape_cast %15 : vector<4x8x8xf32> to vector<1x4x8x8xf32>
    %17 = vector.shape_cast %16 : vector<1x4x8x8xf32> to vector<4x8x8xf32>
    "tpu.trace_start"() <{level = 10 : i32, message = "Bdc,Bcl->Bdl"}> : () -> ()
    %cst_9 = arith.constant dense<0.000000e+00> : vector<4x8x14xf32>
    %18 = tpu.matmul %17, %3, %cst_9 {dimension_numbers = #tpu.dot_dimension_numbers<[2], [1], [1], [2], [0, 0, 0, 1, 1, 2], [0], [0]>} : vector<4x8x8xf32>, vector<4x8x14xf32>, vector<4x8x14xf32> -> vector<4x8x14xf32>
    "tpu.trace_stop"() : () -> ()
    %19 = vector.extract_strided_slice %2 {offsets = [0, 0, 1], sizes = [4, 8, 14], strides = [1, 1, 1]} : vector<4x8x16xf32> to vector<4x8x14xf32>
    %20 = vector.extract_strided_slice %0 {offsets = [0, 1, 0, 0, 0], sizes = [1, 1, 4, 8, 8], strides = [1, 1, 1, 1, 1]} : vector<3x3x4x8x8xf32> to vector<1x1x4x8x8xf32>
    %21 = vector.shape_cast %20 : vector<1x1x4x8x8xf32> to vector<4x8x8xf32>
    %22 = vector.shape_cast %21 : vector<4x8x8xf32> to vector<1x4x8x8xf32>
    %23 = vector.shape_cast %22 : vector<1x4x8x8xf32> to vector<4x8x8xf32>
    "tpu.trace_start"() <{level = 10 : i32, message = "Bdc,Bcl->Bdl"}> : () -> ()
    %cst_10 = arith.constant dense<0.000000e+00> : vector<4x8x14xf32>
    %24 = tpu.matmul %23, %19, %cst_10 {dimension_numbers = #tpu.dot_dimension_numbers<[2], [1], [1], [2], [0, 0, 0, 1, 1, 2], [0], [0]>} : vector<4x8x8xf32>, vector<4x8x14xf32>, vector<4x8x14xf32> -> vector<4x8x14xf32>
    "tpu.trace_stop"() : () -> ()
    %25 = vector.extract_strided_slice %0 {offsets = [1, 1, 0, 0, 0], sizes = [1, 1, 4, 8, 8], strides = [1, 1, 1, 1, 1]} : vector<3x3x4x8x8xf32> to vector<1x1x4x8x8xf32>
    %26 = vector.shape_cast %25 : vector<1x1x4x8x8xf32> to vector<4x8x8xf32>
    %27 = vector.shape_cast %26 : vector<4x8x8xf32> to vector<1x4x8x8xf32>
    %28 = vector.shape_cast %27 : vector<1x4x8x8xf32> to vector<4x8x8xf32>
    "tpu.trace_start"() <{level = 10 : i32, message = "Bdc,Bcl->Bdl"}> : () -> ()
    %cst_11 = arith.constant dense<0.000000e+00> : vector<4x8x14xf32>
    %29 = tpu.matmul %28, %19, %cst_11 {dimension_numbers = #tpu.dot_dimension_numbers<[2], [1], [1], [2], [0, 0, 0, 1, 1, 2], [0], [0]>} : vector<4x8x8xf32>, vector<4x8x14xf32>, vector<4x8x14xf32> -> vector<4x8x14xf32>
    "tpu.trace_stop"() : () -> ()
    %30 = vector.extract_strided_slice %0 {offsets = [2, 1, 0, 0, 0], sizes = [1, 1, 4, 8, 8], strides = [1, 1, 1, 1, 1]} : vector<3x3x4x8x8xf32> to vector<1x1x4x8x8xf32>
    %31 = vector.shape_cast %30 : vector<1x1x4x8x8xf32> to vector<4x8x8xf32>
    %32 = vector.shape_cast %31 : vector<4x8x8xf32> to vector<1x4x8x8xf32>
    %33 = vector.shape_cast %32 : vector<1x4x8x8xf32> to vector<4x8x8xf32>
    "tpu.trace_start"() <{level = 10 : i32, message = "Bdc,Bcl->Bdl"}> : () -> ()
    %cst_12 = arith.constant dense<0.000000e+00> : vector<4x8x14xf32>
    %34 = tpu.matmul %33, %19, %cst_12 {dimension_numbers = #tpu.dot_dimension_numbers<[2], [1], [1], [2], [0, 0, 0, 1, 1, 2], [0], [0]>} : vector<4x8x8xf32>, vector<4x8x14xf32>, vector<4x8x14xf32> -> vector<4x8x14xf32>
    "tpu.trace_stop"() : () -> ()
    %35 = arith.addf %8, %24 : vector<4x8x14xf32>
    %36 = arith.addf %13, %29 : vector<4x8x14xf32>
    %37 = arith.addf %18, %34 : vector<4x8x14xf32>
    %38 = vector.extract_strided_slice %2 {offsets = [0, 0, 2], sizes = [4, 8, 14], strides = [1, 1, 1]} : vector<4x8x16xf32> to vector<4x8x14xf32>
    %39 = vector.extract_strided_slice %0 {offsets = [0, 2, 0, 0, 0], sizes = [1, 1, 4, 8, 8], strides = [1, 1, 1, 1, 1]} : vector<3x3x4x8x8xf32> to vector<1x1x4x8x8xf32>
    %40 = vector.shape_cast %39 : vector<1x1x4x8x8xf32> to vector<4x8x8xf32>
    %41 = vector.shape_cast %40 : vector<4x8x8xf32> to vector<1x4x8x8xf32>
    %42 = vector.shape_cast %41 : vector<1x4x8x8xf32> to vector<4x8x8xf32>
    "tpu.trace_start"() <{level = 10 : i32, message = "Bdc,Bcl->Bdl"}> : () -> ()
    %cst_13 = arith.constant dense<0.000000e+00> : vector<4x8x14xf32>
    %43 = tpu.matmul %42, %38, %cst_13 {dimension_numbers = #tpu.dot_dimension_numbers<[2], [1], [1], [2], [0, 0, 0, 1, 1, 2], [0], [0]>} : vector<4x8x8xf32>, vector<4x8x14xf32>, vector<4x8x14xf32> -> vector<4x8x14xf32>
    "tpu.trace_stop"() : () -> ()
    %44 = vector.extract_strided_slice %0 {offsets = [1, 2, 0, 0, 0], sizes = [1, 1, 4, 8, 8], strides = [1, 1, 1, 1, 1]} : vector<3x3x4x8x8xf32> to vector<1x1x4x8x8xf32>
    %45 = vector.shape_cast %44 : vector<1x1x4x8x8xf32> to vector<4x8x8xf32>
    %46 = vector.shape_cast %45 : vector<4x8x8xf32> to vector<1x4x8x8xf32>
    %47 = vector.shape_cast %46 : vector<1x4x8x8xf32> to vector<4x8x8xf32>
    "tpu.trace_start"() <{level = 10 : i32, message = "Bdc,Bcl->Bdl"}> : () -> ()
    %cst_14 = arith.constant dense<0.000000e+00> : vector<4x8x14xf32>
    %48 = tpu.matmul %47, %38, %cst_14 {dimension_numbers = #tpu.dot_dimension_numbers<[2], [1], [1], [2], [0, 0, 0, 1, 1, 2], [0], [0]>} : vector<4x8x8xf32>, vector<4x8x14xf32>, vector<4x8x14xf32> -> vector<4x8x14xf32>
    "tpu.trace_stop"() : () -> ()
    %49 = vector.extract_strided_slice %0 {offsets = [2, 2, 0, 0, 0], sizes = [1, 1, 4, 8, 8], strides = [1, 1, 1, 1, 1]} : vector<3x3x4x8x8xf32> to vector<1x1x4x8x8xf32>
    %50 = vector.shape_cast %49 : vector<1x1x4x8x8xf32> to vector<4x8x8xf32>
    %51 = vector.shape_cast %50 : vector<4x8x8xf32> to vector<1x4x8x8xf32>
    %52 = vector.shape_cast %51 : vector<1x4x8x8xf32> to vector<4x8x8xf32>
    "tpu.trace_start"() <{level = 10 : i32, message = "Bdc,Bcl->Bdl"}> : () -> ()
    %cst_15 = arith.constant dense<0.000000e+00> : vector<4x8x14xf32>
    %53 = tpu.matmul %52, %38, %cst_15 {dimension_numbers = #tpu.dot_dimension_numbers<[2], [1], [1], [2], [0, 0, 0, 1, 1, 2], [0], [0]>} : vector<4x8x8xf32>, vector<4x8x14xf32>, vector<4x8x14xf32> -> vector<4x8x14xf32>
    "tpu.trace_stop"() : () -> ()
    %54 = arith.addf %35, %43 : vector<4x8x14xf32>
    %55 = arith.addf %36, %48 : vector<4x8x14xf32>
    %56 = arith.addf %37, %53 : vector<4x8x14xf32>
    %cst_16 = arith.constant 5.000000e-01 : f32
    %57 = vector.broadcast %cst_16 : f32 to vector<4x8x14xf32>
    %58 = arith.mulf %54, %57 : vector<4x8x14xf32>
    "tpu.trace_start"() <{level = 10 : i32, message = "Bdl,Bdm->Blm"}> : () -> ()
    %cst_17 = arith.constant dense<0.000000e+00> : vector<4x14x14xf32>
    %59 = tpu.matmul %58, %55, %cst_17 {dimension_numbers = #tpu.dot_dimension_numbers<[1], [1], [2], [2], [0, 0, 0, 2, 1, 2], [0], [0]>} : vector<4x8x14xf32>, vector<4x8x14xf32>, vector<4x14x14xf32> -> vector<4x14x14xf32>
    "tpu.trace_stop"() : () -> ()
    %cst_18 = arith.constant dense<0xFF800000> : vector<4x14xf32>
    %60 = vector.multi_reduction <maximumf>, %59, %cst_18 [2] : vector<4x14x14xf32> to vector<4x14xf32>
    %61 = vector.shape_cast %60 : vector<4x14xf32> to vector<4x14x1xf32>
    %62 = vector.broadcast %61 : vector<4x14x1xf32> to vector<4x14x14xf32>
    %63 = arith.subf %59, %62 : vector<4x14x14xf32>
    %64 = math.exp %63 : vector<4x14x14xf32>
    %cst_19 = arith.constant dense<0.000000e+00> : vector<4x14xf32>
    %65 = vector.multi_reduction <add>, %64, %cst_19 [2] : vector<4x14x14xf32> to vector<4x14xf32>
    %66 = vector.shape_cast %65 : vector<4x14xf32> to vector<4x14x1xf32>
    %67 = tpu.reciprocal %66 : vector<4x14x1xf32> -> vector<4x14x1xf32>
    %68 = vector.broadcast %67 : vector<4x14x1xf32> to vector<4x14x14xf32>
    %69 = arith.mulf %64, %68 : vector<4x14x14xf32>
    "tpu.trace_start"() <{level = 10 : i32, message = "Blm,Bdm->Bld"}> : () -> ()
    %cst_20 = arith.constant dense<0.000000e+00> : vector<4x14x8xf32>
    %70 = tpu.matmul %69, %56, %cst_20 {dimension_numbers = #tpu.dot_dimension_numbers<[2], [2], [1], [1], [0, 0, 0, 1, 1, 1], [0], [0]>} : vector<4x14x14xf32>, vector<4x8x14xf32>, vector<4x14x8xf32> -> vector<4x14x8xf32>
    "tpu.trace_stop"() : () -> ()
    %71 = vector.shape_cast %70 : vector<4x14x8xf32> to vector<1x4x14x8xf32>
    %72 = vector.extract_strided_slice %71 {offsets = [0, 0, 0, 0], sizes = [1, 1, 14, 8], strides = [1, 1, 1, 1]} : vector<1x4x14x8xf32> to vector<1x1x14x8xf32>
    %73 = vector.shape_cast %72 : vector<1x1x14x8xf32> to vector<1x14x8xf32>
    %74 = vector.extract_strided_slice %71 {offsets = [0, 1, 0, 0], sizes = [1, 1, 14, 8], strides = [1, 1, 1, 1]} : vector<1x4x14x8xf32> to vector<1x1x14x8xf32>
    %75 = vector.shape_cast %74 : vector<1x1x14x8xf32> to vector<1x14x8xf32>
    %76 = vector.extract_strided_slice %71 {offsets = [0, 2, 0, 0], sizes = [1, 1, 14, 8], strides = [1, 1, 1, 1]} : vector<1x4x14x8xf32> to vector<1x1x14x8xf32>
    %77 = vector.shape_cast %76 : vector<1x1x14x8xf32> to vector<1x14x8xf32>
    %78 = vector.extract_strided_slice %71 {offsets = [0, 3, 0, 0], sizes = [1, 1, 14, 8], strides = [1, 1, 1, 1]} : vector<1x4x14x8xf32> to vector<1x1x14x8xf32>
    %79 = vector.shape_cast %78 : vector<1x1x14x8xf32> to vector<1x14x8xf32>
    %80 = tpu.concatenate %73, %75, %77, %79 in 2 : vector<1x14x8xf32>, vector<1x14x8xf32>, vector<1x14x8xf32>, vector<1x14x8xf32> -> vector<1x14x32xf32>
    %c0_21 = arith.constant 0 : index
    %c0_22 = arith.constant 0 : index
    %c0_23 = arith.constant 0 : index
    %81 = vector.load %arg3[%c0_21, %c0_22, %c0_23] : memref<1x14x32xf32, #tpu.memory_space<vmem>>, vector<1x14x32xf32>
    %82 = arith.addf %80, %81 : vector<1x14x32xf32>
    %cst_24 = arith.constant dense<0.000000e+00> : vector<1x14xf32>
    %83 = vector.multi_reduction <add>, %82, %cst_24 [2] : vector<1x14x32xf32> to vector<1x14xf32>
    %84 = vector.shape_cast %83 : vector<1x14xf32> to vector<1x14x1xf32>
    %cst_25 = arith.constant 3.200000e+01 : f32
    %85 = vector.broadcast %cst_25 : f32 to vector<1x14x1xf32>
    %86 = arith.divf %84, %85 : vector<1x14x1xf32>
    %87 = vector.broadcast %86 : vector<1x14x1xf32> to vector<1x14x32xf32>
    %88 = arith.subf %82, %87 : vector<1x14x32xf32>
    %89 = arith.mulf %88, %88 : vector<1x14x32xf32>
    %cst_26 = arith.constant dense<0.000000e+00> : vector<1x14xf32>
    %90 = vector.multi_reduction <add>, %89, %cst_26 [2] : vector<1x14x32xf32> to vector<1x14xf32>
    %91 = vector.shape_cast %90 : vector<1x14xf32> to vector<1x14x1xf32>
    %cst_27 = arith.constant 3.200000e+01 : f32
    %92 = vector.broadcast %cst_27 : f32 to vector<1x14x1xf32>
    %93 = arith.divf %91, %92 : vector<1x14x1xf32>
    %94 = vector.broadcast %86 : vector<1x14x1xf32> to vector<1x14x32xf32>
    %95 = arith.subf %82, %94 : vector<1x14x32xf32>
    %cst_28 = arith.constant 9.99999974E-6 : f32
    %96 = vector.broadcast %cst_28 : f32 to vector<1x14x1xf32>
    %97 = arith.addf %93, %96 : vector<1x14x1xf32>
    %98 = math.rsqrt %97 : vector<1x14x1xf32>
    %99 = vector.broadcast %98 : vector<1x14x1xf32> to vector<1x14x32xf32>
    %100 = arith.mulf %95, %99 : vector<1x14x32xf32>
    %c0_29 = arith.constant 0 : index
    %c0_30 = arith.constant 0 : index
    %101 = vector.load %arg4[%c0_29, %c0_30] : memref<1x32xf32, #tpu.memory_space<vmem>>, vector<1x32xf32>
    %102 = vector.shape_cast %101 : vector<1x32xf32> to vector<1x1x32xf32>
    %103 = vector.broadcast %102 : vector<1x1x32xf32> to vector<1x14x32xf32>
    %104 = arith.mulf %100, %103 : vector<1x14x32xf32>
    %c0_31 = arith.constant 0 : index
    %c0_32 = arith.constant 0 : index
    %105 = vector.load %arg5[%c0_31, %c0_32] : memref<1x32xf32, #tpu.memory_space<vmem>>, vector<1x32xf32>
    %106 = vector.shape_cast %105 : vector<1x32xf32> to vector<1x1x32xf32>
    %107 = vector.broadcast %106 : vector<1x1x32xf32> to vector<1x14x32xf32>
    %108 = arith.addf %104, %107 : vector<1x14x32xf32>
    %c0_33 = arith.constant 0 : index
    %c0_34 = arith.constant 0 : index
    %c0_35 = arith.constant 0 : index
    %109 = vector.load %arg6[%c0_33, %c0_34, %c0_35] : memref<1x14x32xf32, #tpu.memory_space<vmem>>, vector<1x14x32xf32>
    tpu.vector_store %arg6[%c0_33, %c0_34, %c0_35], %108 {strides = array<i32>} : memref<1x14x32xf32, #tpu.memory_space<vmem>>, vector<1x14x32xf32>,
    return
  }
  func.func @transform_0(%arg0: i32) -> (i32, i32, i32, i32) {
    %c0_i32 = arith.constant 0 : i32
    %c0_i32_0 = arith.constant 0 : i32
    %c0_i32_1 = arith.constant 0 : i32
    %c0_i32_2 = arith.constant 0 : i32
    return %arg0, %c0_i32, %c0_i32_0, %c0_i32_1 : i32, i32, i32, i32
  }
  func.func @transform_1(%arg0: i32) -> (i32, i32, i32, i32, i32) {
    %c0_i32 = arith.constant 0 : i32
    %c0_i32_0 = arith.constant 0 : i32
    %c0_i32_1 = arith.constant 0 : i32
    %c0_i32_2 = arith.constant 0 : i32
    %c0_i32_3 = arith.constant 0 : i32
    %c0_i32_4 = arith.constant 0 : i32
    return %c0_i32, %c0_i32_0, %c0_i32_1, %c0_i32_2, %c0_i32_3 : i32, i32, i32, i32, i32
  }
  func.func @transform_2(%arg0: i32) -> (i32, i32, i32) {
    %c0_i32 = arith.constant 0 : i32
    %c0_i32_0 = arith.constant 0 : i32
    %c0_i32_1 = arith.constant 0 : i32
    return %arg0, %c0_i32, %c0_i32_0 : i32, i32, i32
  }
  func.func @transform_3(%arg0: i32) -> (i32, i32) {
    %c0_i32 = arith.constant 0 : i32
    %c0_i32_0 = arith.constant 0 : i32
    %c0_i32_1 = arith.constant 0 : i32
    return %c0_i32, %c0_i32_0 : i32, i32
  }
  func.func @transform_4(%arg0: i32) -> (i32, i32) {
    %c0_i32 = arith.constant 0 : i32
    %c0_i32_0 = arith.constant 0 : i32
    %c0_i32_1 = arith.constant 0 : i32
    return %c0_i32, %c0_i32_0 : i32, i32
  }
  func.func @transform_5(%arg0: i32) -> (i32, i32, i32) {
    %c0_i32 = arith.constant 0 : i32
    %c0_i32_0 = arith.constant 0 : i32
    %c0_i32_1 = arith.constant 0 : i32
    return %arg0, %c0_i32, %c0_i32_0 : i32, i32, i32
  }
}

</mosaic_0001>

<bundles_post_ra>
// kernel: tpu_custom_call.1
= control target key start
LH: loop header
LB: loop body
LE: loop exit
PB: predicated region body
PF: predicated region fallthrough
CT: control target
= control target key end

     0   :  { %10 = vsyncpa [#allocation3], 0  ;;  %s5112_s0 = inlined_call_operand.hbm [shape: f32[4,4,8,16], index: 0, kind: input, shape index: {}]   ;;  %s5113_s1 = inlined_call_operand.hbm [shape: f32[3,3,4,8,8], index: 1, kind: input, shape index: {}]   ;;  %s5114_s2 = inlined_call_operand.vmem [shape: f32[4,14,32], index: 2, kind: input, shape index: {}]   ;;  %s5115_s3 = inlined_call_operand.vmem [shape: f32[1,32], index: 3, kind: input, shape index: {}]   ;;  %s5116_s4 = inlined_call_operand.vmem [shape: f32[1,32], index: 4, kind: input, shape index: {}]   ;;  %s5117_s5 = inlined_call_operand.vmem [shape: f32[4,14,32], index: 5, kind: output, shape index: {}]  }
   0x1   :  { %12 = vsyncpa [#allocation3 + $0x1], 0 }
   0x2   :  { %13 = vsyncpa [#allocation5], 0  ;;  %s4720_s18 = smov 0   ;;  %s4722_s19 = smov 0  }
   0x3   :  { %s4724_s20 = smov 0   ;;  %s4726_s21 = smov 0  }
   0x4 LB: > { %s4739_s22 = sadd.s32 4294967295, %s4677_s21   ;;  %p39_p0 = scmp.ne.s32.totalorder %s4669_s19, %s4665_s18  ;;  %s4677_s21 = sphi %s4726_s21, %s5133_s21   ;;  %s4673_s20 = sphi %s4724_s20, %s5132_s20   ;;  %s4669_s19 = sphi %s4722_s19, %s5131_s19   ;;  %s4665_s18 = sphi %s4720_s18, %s5130_s18  }
   0x5   : > { %p5118_p1 = scmp.eq.s32.totalorder %s4739_s22, 0  ;;  %p4046_p2 = scmp.ge.s32.totalorder %s4677_s21, 1 }
   0x6   : > { %p165_p3 = scmp.lt.s32.totalorder %s4677_s21, 5  ;;  %s4679_s25 = smov [#allocation4]  }
   0x7   : > { %p4747_p4 = por %p5118_p1, %p39_p0  ;;  %s177_s26 = sshll.u32 %s4679_s25, 4  ;;  %s178_s26 = int_to_ptr.vmem [resolvable:$true] %s177_s26 }
   0x8   : > { %p4751_p5 = pnand %p4046_p2, %p165_p3  ;;  %s4764_s28 = sadd.s32 1, %s4677_s21  }
   0x9   : > { %s5121_s23 = scalar_select %p4747_p4, 1, 0 }
   0xa   : > { %s5122_s24 = scalar_select %p4751_p5, 1, 0 }
   0xb   : > { %p4492_p6 = pneg %p4751_p5  ;;  %s26_s29 = sadd.s32 1, %s4673_s20 }
   0xc   : > { %s23_s30 = ssub.s32 %s4677_s21, %s4764_s28  ;;  %s4581_s8 = scalar_lea.hbm %s5113_s1, 4608 }
   0xd   : > { %p4759_p7 = pnand %p4492_p6, %p5118_p1  ;;  %p4582_p8 = scmp.ne.s32.totalorder %s5113_s1, %s4581_s8 }
   0xe   : > { %p4588_p12 = scmp.lt.u32.totalorder %s4581_s8, %s5113_s1 }
   0xf   : > { %p4583_p9 = pneg %p4759_p7 }
  0x11   : > { %p4584_p10 = pnand %p4583_p9, %p4582_p8 }
  0x13   : > { %p4585_p11 = pneg %p4584_p10 }
  0x15   : > { %p4590_p13 = pnand %p4588_p12, %p4585_p11 }
  0x17   : > { %4593 = shalt.err (!%p4590_p13)
}
  0x18   : > { %s4594_s13 = scalar_lea.vmem %s178_s26, 4608  ;;  %p4602_p6 = scmp.lt.s32.totalorder %s178_s26, %s178_s26 }
  0x19   : > { %p4595_p0 = scmp.ne.s32.totalorder %s178_s26, %s4594_s13  ;;  %p4603_p1 = scmp.lt.s32.totalorder %s4594_s13, %s4594_s13 }
  0x1b   : > { %p4597_p2 = pnand %p4595_p0, %p4583_p9  ;;  %p4604_p4 = por %p4603_p1, %p4602_p6 }
  0x1d   : > { %p4598_p3 = pneg %p4597_p2 }
  0x1f   : > { %p4605_p5 = pnand %p4604_p4, %p4598_p3 }
  0x21   : > { %4608 = shalt.err (!%p4605_p5)
}
  0x22   : > { %s4680_s14 = smov 128   ;;  %s4681_s15 = smov 8  }
  0x23   : > { %4495 = dma.hbm_to_vmem [thread:$0]  (!%p4759_p7), %s5113_s1, 4608, %s178_s26, [#allocation5], %s4680_s14, %s4680_s14, %s4681_s15  }
  0x24   : > { %p24_p1 = scmp.eq.s32.totalorder %s23_s30, 0  ;;  %p33_p4 = scmp.ne.s32.totalorder %s4673_s20, %s4669_s19 }
  0x25   : > { %p34_p5 = scmp.eq.s32.totalorder %s4677_s21, 0  ;;  %p4501_p8 = scmp.lt.s32.totalorder %s4677_s21, 4 }
  0x26   : > { %s4793_s18 = scalar_select %p24_p1, %s4673_s20, %s26_s29  }
  0x27   : > { %p35_p9 = por %p34_p5, %p33_p4  ;;  %s197_s25 = sand.u32 1, %s4673_s20  }
  0x28   : > { %s4049_s6 = sshll.u32 %s197_s25, 5  ;;  %s4119_s7 = sshll.u32 %s4677_s21, 9 }
  0x29   : > { %s4800_s27 = scalar_lea.hbm %s5112_s0, %s4119_s7  ;;  %s201_s26 = scalar_lea.vmem [#allocation2], %s4049_s6 }
  0x2a   : > { %s208_s30 = sshll.u32 %s201_s26, 4  ;;  %p4804_p7 = pnand %p4501_p8, %p35_p9  ;;  %s4802_s30 = int_to_ptr.vmem [resolvable:$true] %s208_s30 }
  0x2b   : > { %s4808_s21 = scalar_lea.sflag [#allocation3], %s197_s25  ;;  %s4609_s10 = scalar_lea.hbm %s4800_s27, 512 }
  0x2c   : > { %p4610_p10 = scmp.ne.s32.totalorder %s4800_s27, %s4609_s10  ;;  %p4611_p11 = pneg %p4804_p7 }
  0x2d   : > { %s4614_s13 = scalar_lea.hbm %s5112_s0, 2048  ;;  %p4615_p0 = scmp.lt.u32.totalorder %s4800_s27, %s5112_s0 }
  0x2e   : > { %p4612_p12 = pnand %p4611_p11, %p4610_p10  ;;  %p4616_p2 = scmp.lt.u32.totalorder %s4614_s13, %s4609_s10 }
  0x2f   : > { %p4618_p6 = scmp.lt.u32.totalorder %s4609_s10, %s4800_s27 }
  0x30   : > { %p4613_p13 = pneg %p4612_p12  ;;  %p4617_p3 = por %p4616_p2, %p4615_p0 }
  0x32   : > { %p4619_p1 = por %p4618_p6, %p4617_p3 }
  0x34   : > { %p4620_p4 = pnand %p4619_p1, %p4613_p13 }
  0x36   : > { %4623 = shalt.err (!%p4620_p4)
}
  0x37   : > { %s4624_s25 = scalar_lea.vmem %s4802_s30, 512  ;;  %s4682_s6 = smov [#allocation2]  }
  0x38   : > { %p4625_p5 = scmp.ne.s32.totalorder %s4802_s30, %s4624_s25  ;;  %s4629_s7 = sshll.u32 %s4682_s6, 4  ;;  %s4630_s7 = int_to_ptr.vmem [resolvable:$false] %s4629_s7 }
  0x39   : > { %s4631_s8 = scalar_lea.vmem %s4630_s7, 1024  ;;  %p4632_p10 = scmp.lt.s32.totalorder %s4802_s30, %s4630_s7 }
  0x3a   : > { %p4627_p8 = pnand %p4625_p5, %p4611_p11  ;;  %p4633_p12 = scmp.lt.s32.totalorder %s4631_s8, %s4624_s25 }
  0x3c   : > { %p4628_p9 = pneg %p4627_p8  ;;  %p4634_p0 = por %p4633_p12, %p4632_p10 }
  0x3e   : > { %p4635_p2 = pnand %p4634_p0, %p4628_p9 }
  0x40   : > { %4638 = shalt.err (!%p4635_p2)
}
  0x41   : > { %4499 = dma.hbm_to_vmem [thread:$0]  (!%p4804_p7), %s4800_s27, 512, %s4802_s30, %s4808_s21, %s4680_s14, %s4680_s14, %s4681_s15  }
  0x42   : > { %p5125_p11 = scmp.ne.s32.totalorder %s5122_s24, 0 }
  0x43   : > { %s230_s9 = sand.u32 (!%p5125_p11), 1, %s4669_s19   ;;  %p5126_p13 = scmp.ne.s32.totalorder (!%p5125_p11), %s5121_s23, 0 }
  0x44   : > { %228 = sbr.rel (%p5125_p11) target bundleno = 1783 (0x6f7), region = 40  ;;  %s4053_s26 = sshll.u32 (!%p5125_p11), %s230_s9, 5 }
  0x45   : > { %s231_s10 = scalar_lea.sflag (!%p5125_p11), [#allocation3], %s230_s9  ;;  %s234_s11 = scalar_lea.vmem (!%p5125_p11), [#allocation2], %s4053_s26 }
  0x4b   : > { %4656 = dma.done.wait (%p5126_p13), %s231_s10, 512  }
  0x4c   : > { %4658 = vsyncadd (%p5126_p13), %s231_s10, 4294966784  ;;  %p5127_p3 = scmp.eq.s32.totalorder %s4739_s22, 0 }
  0x4e   : > { %4660 = dma.done.wait (%p5127_p3), [#allocation5], 4608   ;;  %p5128_p6 = pmov %p5127_p3 }
  0x4f   : > { %v4683_v0 = vmov 0.0   ;;  %vm4684_vm0 = vmmov 0   ;;  %v4856_v1 = vld [vmem:[%s234_s11] sm:$0xff]  ;;  %v4858_v2 = vld [vmem:[%s234_s11 + $0x10] sm:$0xff]  ;;  %s4685_s23 = smov 127   ;;  %v4862_v3 = vld [vmem:[%s234_s11 + $0x8] sm:$0xff] }
  0x50   : > { %4662 = vsyncadd (%p5128_p6), [#allocation5], 4294962688  ;;  %4218 = vmatprep.subr.mxu0 %v4683_v0  ;;  %4220 = vmatprep.mubr.msk.f32.mxu0 %vm4684_vm0, %v4683_v0  ;;  %v4864_v4 = vld [vmem:[%s234_s11 + $0x18] sm:$0xff]  ;;  %s4686_s24 = smov 126   ;;  %v284_v5 = vld [vmem:[#allocation4 + $0x20] sm:$0xff]  ;;  %vm324_vm1 = vcmask 64512  }
  0x51   : > { %4223 = vmatprep.subr.mxu1 %v4683_v0  ;;  %4225 = vmatprep.mubr.msk.f32.mxu1 %vm4684_vm0, %v4683_v0  ;;  %v285_v8 = vld [vmem:[#allocation4 + $0x28] sm:$0xff]  ;;  %v286_v9 = vld [vmem:[#allocation4 + $0x30] sm:$0xff]  ;;  %v287_v12 = vld [vmem:[#allocation4 + $0x38] sm:$0xff]  ;;  %vm3445_vm2 = vcmask 113664   ;;  %vm3449_vm3 = vcmask 111616   ;;  %s4687_s14 = smov 8  }
  0x52   : > { %321 = vrot.lane.b32.xlu0 %v4856_v1, %s4685_s23  ;;  %476 = vrot.lane.b32.xlu1 %v4858_v2, %s4685_s23  ;;  %v296_v13 = vld [vmem:[#allocation4 + $0x80] sm:$0xff]  ;;  %v297_v14 = vld [vmem:[#allocation4 + $0x88] sm:$0xff]  ;;  %v298_v15 = vld [vmem:[#allocation4 + $0x90] sm:$0xff]  ;;  %s4688_s15 = smov 16   ;;  %s4689_s27 = smov 24   ;;  %vm3897_vm4 = vcmask 130048  }
  0x53   : > { %v299_v16 = vld [vmem:[#allocation4 + $0x98] sm:$0xff]  ;;  %v308_v17 = vld [vmem:[#allocation4 + $0xe0] sm:$0xff]  ;;  %v309_v18 = vld [vmem:[#allocation4 + $0xe8] sm:$0xff]  ;;  %p270_p7 = scmp.lt.s32.totalorder %s4739_s22, 3  ;;  %vm3900_vm5 = vcmask 195584   ;;  %vm3911_vm6 = vcmask 259072  }
  0x54   : > { %v310_v19 = vld [vmem:[#allocation4 + $0xf0] sm:$0xff]  ;;  %v311_v20 = vld [vmem:[#allocation4 + $0xf8] sm:$0xff]  ;;  %v280_v21 = vld [vmem:[#allocation4] sm:$0xff]  ;;  %vm3907_vm7 = vcmask 261120  }
  0x55   : > { %v281_v22 = vld [vmem:[#allocation4 + $0x8] sm:$0xff]  ;;  %v282_v23 = vld [vmem:[#allocation4 + $0x10] sm:$0xff]  ;;  %v283_v24 = vld [vmem:[#allocation4 + $0x18] sm:$0xff]  ;;  %s5135_s22 = smov (!%p270_p7, %s4739_s22), 3 }
  0x56   : > { %399 = vrot.lane.b32.xlu0 %v4862_v3, %s4685_s23  ;;  %553 = vrot.lane.b32.xlu1 %v4864_v4, %s4685_s23  ;;  %v292_v25 = vld [vmem:[#allocation4 + $0x60] sm:$0xff]  ;;  %v293_v26 = vld [vmem:[#allocation4 + $0x68] sm:$0xff]  ;;  %v294_v27 = vld [vmem:[#allocation4 + $0x70] sm:$0xff]  ;;  %s4120_s30 = sshll.u32 %s5135_s22, 4 }
  0x57   : > { %v295_v28 = vld [vmem:[#allocation4 + $0x78] sm:$0xff]  ;;  %v304_v29 = vld [vmem:[#allocation4 + $0xc0] sm:$0xff]  ;;  %v305_v31 = vld [vmem:[#allocation4 + $0xc8] sm:$0xff]  ;;  %s274_s12 = scalar_lea.vmem %s5114_s2, %s4120_s30  ;;  %s279_s8 = scalar_lea.vmem %s5117_s5, %s4120_s30 }
  0x58   : > { %v306_v32 = vld [vmem:[#allocation4 + $0xd0] sm:$0xff]  ;;  %v307_v34 = vld [vmem:[#allocation4 + $0xd8] sm:$0xff]  ;;  %v288_v35 = vld [vmem:[#allocation4 + $0x40] sm:$0xff] }
  0x59   : > { %v289_v37 = vld [vmem:[#allocation4 + $0x48] sm:$0xff]  ;;  %v290_v38 = vld [vmem:[#allocation4 + $0x50] sm:$0xff]  ;;  %v291_v40 = vld [vmem:[#allocation4 + $0x58] sm:$0xff] }
  0x5a   : > { %2089 = vrot.lane.b32.xlu0 %v4856_v1, %s4686_s24  ;;  %2165 = vrot.lane.b32.xlu1 %v4862_v3, %s4686_s24  ;;  %v300_v41 = vld [vmem:[#allocation4 + $0xa0] sm:$0xff]  ;;  %v301_v42 = vld [vmem:[#allocation4 + $0xa8] sm:$0xff]  ;;  %v302_v43 = vld [vmem:[#allocation4 + $0xb0] sm:$0xff] }
  0x5b   : > { %v303_v44 = vld [vmem:[#allocation4 + $0xb8] sm:$0xff]  ;;  %v312_v45 = vld [vmem:[#allocation4 + $0x100] sm:$0xff]  ;;  %v313_v46 = vld [vmem:[#allocation4 + $0x108] sm:$0xff] }
  0x5c   : > { %v314_v47 = vld [vmem:[#allocation4 + $0x110] sm:$0xff]  ;;  %v315_v48 = vld [vmem:[#allocation4 + $0x118] sm:$0xff] }
  0x5e   : > { %2241 = vrot.lane.b32.xlu0 %v4858_v2, %s4686_s24  ;;  %2317 = vrot.lane.b32.xlu1 %v4864_v4, %s4686_s24 }
  0xc4   : > { %v322_v6 = vpop.permute.xlu0 %321  ;;  %v477_v7 = vpop.permute.xlu1 %476 }
  0xc5   : > { %4219 = vmatpush3.msra.mxu0 %v322_v6 }
  0xc6   : > { %4221 = vmatmul.mubr.msk.f32.vlgmr.msra.gmra.mrb[0].mxu0 %vm324_vm1, %v284_v5  ;;  %4228 = vmatprep.subr.mxu0 %v4683_v0 }
  0xc7   : > { %4229 = vmatpush3.msra.mxu0 %v477_v7  ;;  %4230 = vmatprep.mubr.msk.f32.mxu0 %vm4684_vm0, %v4683_v0 }
  0xc8   : > { %v400_v10 = vpop.permute.xlu0 %399  ;;  %4238 = vmatprep.subr.mxu0 %v4683_v0  ;;  %v554_v11 = vpop.permute.xlu1 %553 }
  0xc9   : > { %4224 = vmatpush3.msra.mxu1 %v400_v10 }
  0xca   : > { %4226 = vmatmul.mubr.msk.f32.vlgmr.msra.gmra.mrb[0].mxu1 %vm324_vm1, %v285_v8  ;;  %4231 = vmatmul.mubr.msk.f32.vlgmr.msra.gmra.mrb[2].mxu0 %vm324_vm1, %v286_v9 }
  0xcb   : > { %4239 = vmatpush3.msra.mxu0 %v322_v6  ;;  %4233 = vmatprep.subr.mxu1 %v4683_v0 }
  0xcc   : > { %4234 = vmatpush3.msra.mxu1 %v554_v11  ;;  %4235 = vmatprep.mubr.msk.f32.mxu1 %vm4684_vm0, %v4683_v0  ;;  %v2090_v30 = vpop.permute.xlu0 %2089  ;;  %v2166_v33 = vpop.permute.xlu1 %2165 }
  0xcd   : > { %4240 = vmatprep.mubr.msk.f32.mxu0 %vm4684_vm0, %v4683_v0  ;;  %4243 = vmatprep.subr.mxu1 %v4683_v0 }
  0xce   : > { %4248 = vmatprep.subr.mxu0 %v4683_v0  ;;  %4236 = vmatmul.mubr.msk.f32.vlgmr.msra.gmra.mrb[2].mxu1 %vm324_vm1, %v287_v12 }
  0xcf   : > { %4241 = vmatmul.mubr.msk.f32.vlgmr.msra.gmra.mrb[4].mxu0 %vm324_vm1, %v296_v13  ;;  %4244 = vmatpush3.msra.mxu1 %v400_v10 }
  0xd0   : > { %4249 = vmatpush3.msra.mxu0 %v477_v7  ;;  %4245 = vmatprep.mubr.msk.f32.mxu1 %vm4684_vm0, %v4683_v0  ;;  %v2242_v36 = vpop.permute.xlu0 %2241  ;;  %v2318_v39 = vpop.permute.xlu1 %2317 }
  0xd1   : > { %4250 = vmatprep.mubr.msk.f32.mxu0 %vm4684_vm0, %v4683_v0  ;;  %4253 = vmatprep.subr.mxu1 %v4683_v0 }
  0xd2   : > { %4258 = vmatprep.subr.mxu0 %v4683_v0  ;;  %4246 = vmatmul.mubr.msk.f32.vlgmr.msra.gmra.mrb[4].mxu1 %vm324_vm1, %v297_v14 }
  0xd3   : > { %4251 = vmatmul.mubr.msk.f32.vlgmr.msra.gmra.mrb[6].mxu0 %vm324_vm1, %v298_v15  ;;  %4254 = vmatpush3.msra.mxu1 %v554_v11 }
  0xd4   : > { %4259 = vmatpush3.msra.mxu0 %v322_v6  ;;  %4255 = vmatprep.mubr.msk.f32.mxu1 %vm4684_vm0, %v4683_v0 }
  0xd5   : > { %4260 = vmatprep.mubr.msk.f32.mxu0 %vm4684_vm0, %v4683_v0  ;;  %4263 = vmatprep.subr.mxu1 %v4683_v0 }
  0xd6   : > { %4268 = vmatprep.subr.mxu0 %v4683_v0  ;;  %4256 = vmatmul.mubr.msk.f32.vlgmr.msra.gmra.mrb[6].mxu1 %vm324_vm1, %v299_v16 }
  0xd7   : > { %4261 = vmatmul.mubr.msk.f32.vlgmr.msra.gmra.mrb[8].mxu0 %vm324_vm1, %v308_v17  ;;  %4264 = vmatpush3.msra.mxu1 %v400_v10 }
  0xd8   : > { %4269 = vmatpush3.msra.mxu0 %v477_v7  ;;  %4265 = vmatprep.mubr.msk.f32.mxu1 %vm4684_vm0, %v4683_v0 }
  0xd9   : > { %4270 = vmatprep.mubr.msk.f32.mxu0 %vm4684_vm0, %v4683_v0  ;;  %4273 = vmatprep.subr.mxu1 %v4683_v0 }
  0xda   : > { %4266 = vmatmul.mubr.msk.f32.vlgmr.msra.gmra.mrb[8].mxu1 %vm324_vm1, %v309_v18  ;;  %4278 = vmatprep.subr.mxu0 %v4683_v0 }
  0xdb   : > { %4271 = vmatmul.mubr.msk.f32.vlgmr.msra.gmra.mrb[10].mxu0 %vm324_vm1, %v310_v19  ;;  %4274 = vmatpush3.msra.mxu1 %v554_v11 }
  0xdc   : > { %4279 = vmatpush3.msra.mxu0 %v4856_v1  ;;  %4275 = vmatprep.mubr.msk.f32.mxu1 %vm4684_vm0, %v4683_v0 }
  0xdd   : > { %4280 = vmatprep.mubr.msk.f32.mxu0 %vm4684_vm0, %v4683_v0  ;;  %4288 = vmatprep.subr.mxu0 %v4683_v0 }
  0xde   : > { %4276 = vmatmul.mubr.msk.f32.vlgmr.msra.gmra.mrb[10].mxu1 %vm324_vm1, %v311_v20  ;;  %4283 = vmatprep.subr.mxu1 %v4683_v0 }
  0xdf   : > { %4281 = vmatmul.mubr.msk.f32.vlgmr.msra.gmra.mrb[0].mxu0 %vm324_vm1, %v280_v21  ;;  %4284 = vmatpush3.msra.mxu1 %v4862_v3 }
  0xe0   : > { %4289 = vmatpush3.msra.mxu0 %v4858_v2  ;;  %4285 = vmatprep.mubr.msk.f32.mxu1 %vm4684_vm0, %v4683_v0 }
  0xe1   : > { %4290 = vmatprep.mubr.msk.f32.mxu0 %vm4684_vm0, %v4683_v0  ;;  %4298 = vmatprep.subr.mxu0 %v4683_v0 }
  0xe2   : > { %4286 = vmatmul.mubr.msk.f32.vlgmr.msra.gmra.mrb[0].mxu1 %vm324_vm1, %v281_v22  ;;  %4293 = vmatprep.subr.mxu1 %v4683_v0 }
  0xe3   : > { %4291 = vmatmul.mubr.msk.f32.vlgmr.msra.gmra.mrb[2].mxu0 %vm324_vm1, %v282_v23  ;;  %4294 = vmatpush3.msra.mxu1 %v4864_v4 }
  0xe4   : > { %4299 = vmatpush3.msra.mxu0 %v4856_v1  ;;  %4295 = vmatprep.mubr.msk.f32.mxu1 %vm4684_vm0, %v4683_v0 }
  0xe5   : > { %4300 = vmatprep.mubr.msk.f32.mxu0 %vm4684_vm0, %v4683_v0  ;;  %4308 = vmatprep.subr.mxu0 %v4683_v0 }
  0xe6   : > { %4296 = vmatmul.mubr.msk.f32.vlgmr.msra.gmra.mrb[2].mxu1 %vm324_vm1, %v283_v24  ;;  %4303 = vmatprep.subr.mxu1 %v4683_v0 }
  0xe7   : > { %4301 = vmatmul.mubr.msk.f32.vlgmr.msra.gmra.mrb[4].mxu0 %vm324_vm1, %v292_v25  ;;  %4304 = vmatpush3.msra.mxu1 %v4862_v3 }
  0xe8   : > { %4309 = vmatpush3.msra.mxu0 %v4858_v2  ;;  %4305 = vmatprep.mubr.msk.f32.mxu1 %vm4684_vm0, %v4683_v0 }
  0xe9   : > { %4310 = vmatprep.mubr.msk.f32.mxu0 %vm4684_vm0, %v4683_v0  ;;  %4318 = vmatprep.subr.mxu0 %v4683_v0 }
  0xea   : > { %4306 = vmatmul.mubr.msk.f32.vlgmr.msra.gmra.mrb[4].mxu1 %vm324_vm1, %v293_v26  ;;  %4313 = vmatprep.subr.mxu1 %v4683_v0 }
  0xeb   : > { %4311 = vmatmul.mubr.msk.f32.vlgmr.msra.gmra.mrb[6].mxu0 %vm324_vm1, %v294_v27  ;;  %4314 = vmatpush3.msra.mxu1 %v4864_v4 }
  0xec   : > { %4319 = vmatpush3.msra.mxu0 %v4856_v1  ;;  %4315 = vmatprep.mubr.msk.f32.mxu1 %vm4684_vm0, %v4683_v0 }
  0xed   : > { %4320 = vmatprep.mubr.msk.f32.mxu0 %vm4684_vm0, %v4683_v0  ;;  %4328 = vmatprep.subr.mxu0 %v4683_v0 }
  0xee   : > { %4316 = vmatmul.mubr.msk.f32.vlgmr.msra.gmra.mrb[6].mxu1 %vm324_vm1, %v295_v28  ;;  %4323 = vmatprep.subr.mxu1 %v4683_v0 }
  0xef   : > { %4321 = vmatmul.mubr.msk.f32.vlgmr.msra.gmra.mrb[8].mxu0 %vm324_vm1, %v304_v29  ;;  %4324 = vmatpush3.msra.mxu1 %v4862_v3 }
  0xf0   : > { %4329 = vmatpush3.msra.mxu0 %v4858_v2  ;;  %4325 = vmatprep.mubr.msk.f32.mxu1 %vm4684_vm0, %v4683_v0 }
  0xf1   : > { %4330 = vmatprep.mubr.msk.f32.mxu0 %vm4684_vm0, %v4683_v0  ;;  %4338 = vmatprep.subr.mxu0 %v4683_v0 }
  0xf2   : > { %4326 = vmatmul.mubr.msk.f32.vlgmr.msra.gmra.mrb[8].mxu1 %vm324_vm1, %v305_v31  ;;  %4333 = vmatprep.subr.mxu1 %v4683_v0 }
  0xf3   : > { %4331 = vmatmul.mubr.msk.f32.vlgmr.msra.gmra.mrb[10].mxu0 %vm324_vm1, %v306_v32  ;;  %4334 = vmatpush3.msra.mxu1 %v4864_v4 }
  0xf4   : > { %4339 = vmatpush3.msra.mxu0 %v2090_v30  ;;  %4335 = vmatprep.mubr.msk.f32.mxu1 %vm4684_vm0, %v4683_v0 }
  0xf5   : > { %4340 = vmatprep.mubr.msk.f32.mxu0 %vm4684_vm0, %v4683_v0  ;;  %4343 = vmatprep.subr.mxu1 %v4683_v0 }
  0xf6   : > { %4336 = vmatmul.mubr.msk.f32.vlgmr.msra.gmra.mrb[10].mxu1 %vm324_vm1, %v307_v34  ;;  %4348 = vmatprep.subr.mxu0 %v4683_v0 }
  0xf7   : > { %4341 = vmatmul.mubr.msk.f32.vlgmr.msra.gmra.mrb[0].mxu0 %vm324_vm1, %v288_v35  ;;  %4344 = vmatpush3.msra.mxu1 %v2166_v33 }
  0xf8   : > { %4349 = vmatpush3.msra.mxu0 %v2242_v36  ;;  %4345 = vmatprep.mubr.msk.f32.mxu1 %vm4684_vm0, %v4683_v0 }
  0xf9   : > { %4350 = vmatprep.mubr.msk.f32.mxu0 %vm4684_vm0, %v4683_v0  ;;  %4358 = vmatprep.subr.mxu0 %v4683_v0 }
  0xfa   : > { %4346 = vmatmul.mubr.msk.f32.vlgmr.msra.gmra.mrb[0].mxu1 %vm324_vm1, %v289_v37  ;;  %4353 = vmatprep.subr.mxu1 %v4683_v0 }
  0xfb   : > { %4351 = vmatmul.mubr.msk.f32.vlgmr.msra.gmra.mrb[2].mxu0 %vm324_vm1, %v290_v38  ;;  %4354 = vmatpush3.msra.mxu1 %v2318_v39 }
  0xfc   : > { %4359 = vmatpush3.msra.mxu0 %v2090_v30  ;;  %4355 = vmatprep.mubr.msk.f32.mxu1 %vm4684_vm0, %v4683_v0 }
  0xfd   : > { %4360 = vmatprep.mubr.msk.f32.mxu0 %vm4684_vm0, %v4683_v0  ;;  %4363 = vmatprep.subr.mxu1 %v4683_v0 }
  0xfe   : > { %4368 = vmatprep.subr.mxu0 %v4683_v0  ;;  %4356 = vmatmul.mubr.msk.f32.vlgmr.msra.gmra.mrb[2].mxu1 %vm324_vm1, %v291_v40 }
  0xff   : > { %4361 = vmatmul.mubr.msk.f32.vlgmr.msra.gmra.mrb[4].mxu0 %vm324_vm1, %v300_v41  ;;  %4364 = vmatpush3.msra.mxu1 %v2166_v33 }
 0x100   : > { %4369 = vmatpush3.msra.mxu0 %v2242_v36  ;;  %4365 = vmatprep.mubr.msk.f32.mxu1 %vm4684_vm0, %v4683_v0 }
 0x101   : > { %4370 = vmatprep.mubr.msk.f32.mxu0 %vm4684_vm0, %v4683_v0  ;;  %4378 = vmatprep.subr.mxu0 %v4683_v0 }
 0x102   : > { %4366 = vmatmul.mubr.msk.f32.vlgmr.msra.gmra.mrb[4].mxu1 %vm324_vm1, %v301_v42  ;;  %4373 = vmatprep.subr.mxu1 %v4683_v0 }
 0x103   : > { %4371 = vmatmul.mubr.msk.f32.vlgmr.msra.gmra.mrb[6].mxu0 %vm324_vm1, %v302_v43  ;;  %4374 = vmatpush3.msra.mxu1 %v2318_v39 }
 0x104   : > { %4379 = vmatpush3.msra.mxu0 %v2090_v30  ;;  %4375 = vmatprep.mubr.msk.f32.mxu1 %vm4684_vm0, %v4683_v0 }
 0x105   : > { %4380 = vmatprep.mubr.msk.f32.mxu0 %vm4684_vm0, %v4683_v0  ;;  %4383 = vmatprep.subr.mxu1 %v4683_v0 }
 0x106   : > { %4388 = vmatprep.subr.mxu0 %v4683_v0  ;;  %4376 = vmatmul.mubr.msk.f32.vlgmr.msra.gmra.mrb[6].mxu1 %vm324_vm1, %v303_v44 }
 0x107   : > { %4381 = vmatmul.mubr.msk.f32.vlgmr.msra.gmra.mrb[8].mxu0 %vm324_vm1, %v312_v45  ;;  %4384 = vmatpush3.msra.mxu1 %v2166_v33 }
 0x108   : > { %4389 = vmatpush3.msra.mxu0 %v2242_v36  ;;  %4385 = vmatprep.mubr.msk.f32.mxu1 %vm4684_vm0, %v4683_v0 }
 0x109   : > { %4390 = vmatprep.mubr.msk.f32.mxu0 %vm4684_vm0, %v4683_v0  ;;  %4393 = vmatprep.subr.mxu1 %v4683_v0 }
 0x10a   : > { %4386 = vmatmul.mubr.msk.f32.vlgmr.msra.gmra.mrb[8].mxu1 %vm324_vm1, %v313_v46 }
 0x10b   : > { %4391 = vmatmul.mubr.msk.f32.vlgmr.msra.gmra.mrb[10].mxu0 %vm324_vm1, %v314_v47  ;;  %4394 = vmatpush3.msra.mxu1 %v2318_v39 }
 0x10c   : > { %4395 = vmatprep.mubr.msk.f32.mxu1 %vm4684_vm0, %v4683_v0 }
 0x10e   : > { %4396 = vmatmul.mubr.msk.f32.vlgmr.msra.gmra.mrb[10].mxu1 %vm324_vm1, %v315_v48 }
 0x1ca   : > { %v2161_v49 = vpop.f32.mrb[0].mxu0 }
 0x1cb   : > { %v2989_v50 = vmul.f32 0.5, %v2161_v49  ;;  %v4342_v51 = vpop.f32.mrb[1].mxu0 }
 0x1cd   : > { %2993 = vxpose.xlu0.b32.start.end [1/1] (short) (narrow) %v2989_v50, 16  ;;  %v2237_v52 = vpop.f32.mrb[0].mxu1 }
 0x1ce   : > { %v2990_v53 = vmul.f32 0.5, %v2237_v52  ;;  %v2313_v54 = vpop.f32.mrb[2].mxu0  ;;  %v4347_v55 = vpop.f32.mrb[1].mxu1 }
 0x1cf   : > { %v2991_v56 = vmul.f32 0.5, %v2313_v54  ;;  %v4352_v57 = vpop.f32.mrb[3].mxu0 }
 0x1d0   : > { %3106 = vxpose.xlu1.b32.start.end [1/1] (short) (narrow) %v2990_v53, 16 }
 0x1d1   : > { %v2389_v58 = vpop.f32.mrb[2].mxu1 }
 0x1d2   : > { %3219 = vxpose.xlu0.b32.start.end [1/1] (short) (narrow) %v2991_v56, 16  ;;  %v2462_v59 = vpop.f32.mrb[4].mxu0  ;;  %v4357_v60 = vpop.f32.mrb[3].mxu1  ;;  %v2992_v62 = vmul.f32 0.5, %v2389_v58 }
 0x1d3   : > { %v4362_v61 = vpop.f32.mrb[5].mxu0  ;;  %4398 = vmatprep.subr.mxu0 %v2462_v59 }
 0x1d4   : > { %4399 = vmatpush3.msra.mxu0 %v2462_v59 }
 0x1d5   : > { %v2535_v63 = vpop.f32.mrb[4].mxu1 }
 0x1d6   : > { %v2608_v0 = vpop.f32.mrb[6].mxu0  ;;  %v4367_v1 = vpop.f32.mrb[5].mxu1  ;;  %4403 = vmatprep.subr.mxu1 %v2535_v63 }
 0x1d7   : > { %3332 = vxpose.xlu0.b32.start.end [1/1] (short) (narrow) %v2992_v62, 16  ;;  %v4372_v2 = vpop.f32.mrb[7].mxu0  ;;  %4408 = vmatprep.subr.mxu0 %v2608_v0 }
 0x1d8   : > { %4404 = vmatpush3.msra.mxu1 %v2535_v63 }
 0x1d9   : > { %v2681_v3 = vpop.f32.mrb[6].mxu1 }
 0x1da   : > { %v2754_v4 = vpop.f32.mrb[8].mxu0  ;;  %v4377_v5 = vpop.f32.mrb[7].mxu1  ;;  %4413 = vmatprep.subr.mxu1 %v2681_v3 }
 0x1db   : > { %v4382_v6 = vpop.f32.mrb[9].mxu0 }
 0x1dd   : > { %v2827_v7 = vpop.f32.mrb[8].mxu1 }
 0x1de   : > { %v5022_v8 = vpop.f32.mrb[10].mxu0  ;;  %v4387_v9 = vpop.f32.mrb[9].mxu1 }
 0x1df   : > { %v4392_v10 = vpop.f32.mrb[11].mxu0 }
 0x1e1   : > { %v5024_v11 = vpop.f32.mrb[10].mxu1 }
 0x1e2   : > { %v4397_v12 = vpop.f32.mrb[11].mxu1 }
 0x24d   : > { %v3009_v13 = vpop.trf.xlu0 }
 0x24e   : > { %4400 = vmatprep.mubr.msk.f32.mxu0 %vm324_vm1, %v3009_v13 }
 0x250   : > { %v3122_v14 = vpop.trf.xlu1 }
 0x251   : > { %v3010_v15 = vpop.trf.xlu0  ;;  %4405 = vmatprep.mubr.msk.f32.mxu1 %vm324_vm1, %v3122_v14 }
 0x252   : > { %4401 = vmatmul.mubr.msk.f32.vlgmr.msra.gmra.mrb[12].mxu0 %vm324_vm1, %v3010_v15 }
 0x253   : > { %4409 = vmatpush3.msra.mxu0 %v2608_v0 }
 0x254   : > { %4418 = vmatprep.subr.msk.mxu0 %vm3445_vm2, %v2754_v4  ;;  %v3123_v16 = vpop.trf.xlu1 }
 0x255   : > { %v3235_v17 = vpop.trf.xlu0  ;;  %4406 = vmatmul.mubr.msk.f32.vlgmr.msra.gmra.mrb[12].mxu1 %vm324_vm1, %v3123_v16 }
 0x256   : > { %4414 = vmatpush3.msra.mxu1 %v2681_v3  ;;  %4410 = vmatprep.mubr.msk.f32.mxu0 %vm324_vm1, %v3235_v17 }
 0x257   : > { %4423 = vmatprep.subr.msk.mxu1 %vm3445_vm2, %v2827_v7 }
 0x259   : > { %v3236_v18 = vpop.trf.xlu0 }
 0x25a   : > { %4411 = vmatmul.mubr.msk.f32.vlgmr.msra.gmra.mrb[14].mxu0 %vm324_vm1, %v3236_v18 }
 0x25b   : > { %4419 = vmatpush3.xpose.msk.msra.mxu0 %vm3445_vm2, %v2754_v4 }
 0x25c   : > { %4428 = vmatprep.subr.msk.mxu0 %vm3445_vm2, %v5022_v8 }
 0x25d   : > { %v3348_v19 = vpop.trf.xlu0 }
 0x25e   : > { %4415 = vmatprep.mubr.msk.f32.mxu1 %vm324_vm1, %v3348_v19 }
 0x261   : > { %v3349_v20 = vpop.trf.xlu0 }
 0x262   : > { %4416 = vmatmul.mubr.msk.f32.vlgmr.msra.gmra.mrb[14].mxu1 %vm324_vm1, %v3349_v20 }
 0x263   : > { %4424 = vmatpush3.xpose.msk.msra.mxu1 %vm3445_vm2, %v2827_v7 }
 0x264   : > { %4433 = vmatprep.subr.msk.mxu1 %vm3445_vm2, %v5024_v11 }
 0x325   : > { %v4402_v21 = vpop.f32.mrb[12].mxu0 }
 0x326   : > { %v3097_v22 = vpop.f32.mrb[13].mxu0  ;;  %v3450_v23 = vsel %vm3449_vm3, %v4402_v21, -inf }
 0x327   : > { %3451 = vmax.xlane.f32.xlu1 %v3450_v23  ;;  %v3446_v24 = vsel %vm3445_vm2, %v3097_v22, -inf }
 0x328   : > { %3447 = vmax.xlane.f32.xlu0 %v3446_v24  ;;  %v4407_v25 = vpop.f32.mrb[12].mxu1 }
 0x329   : > { %v3210_v26 = vpop.f32.mrb[13].mxu1  ;;  %v3456_v27 = vsel %vm3449_vm3, %v4407_v25, -inf }
 0x32a   : > { %v3453_v30 = vsel %vm3445_vm2, %v3210_v26, -inf }
 0x32b   : > { %3457 = vmax.xlane.f32.xlu1 %v3456_v27 }
 0x32d   : > { %v4412_v28 = vpop.f32.mrb[14].mxu0 }
 0x32e   : > { %v3323_v29 = vpop.f32.mrb[15].mxu0  ;;  %v3462_v32 = vsel %vm3449_vm3, %v4412_v28, -inf }
 0x32f   : > { %3454 = vmax.xlane.f32.xlu1 %v3453_v30  ;;  %v3459_v31 = vsel %vm3445_vm2, %v3323_v29, -inf }
 0x330   : > { %3460 = vmax.xlane.f32.xlu0 %v3459_v31 }
 0x333   : > { %3463 = vmax.xlane.f32.xlu1 %v3462_v32 }
 0x335   : > { %v4417_v33 = vpop.f32.mrb[14].mxu1 }
 0x336   : > { %v3436_v34 = vpop.f32.mrb[15].mxu1  ;;  %v3468_v35 = vsel %vm3449_vm3, %v4417_v33, -inf }
 0x337   : > { %3469 = vmax.xlane.f32.xlu1 %v3468_v35  ;;  %v3465_v36 = vsel %vm3445_vm2, %v3436_v34, -inf }
 0x338   : > { %3466 = vmax.xlane.f32.xlu0 %v3465_v36 }
 0x3b4   : > { %v3452_v37 = vpop.xlane.xlu1 %3451 }
 0x3b5   : > { %v3472_v38 = vsub.f32 %v4402_v21, %v3452_v37  ;;  %v3448_v39 = vpop.xlane.xlu0 %3447 }
 0x3b6   : > { %v3471_v40 = vsub.f32 %v3097_v22, %v3448_v39 }
 0x3b7   : > { %v3481_v41 = vmul.f32 1.442695, %v3472_v38 }
 0x3b8   : > { %v3479_v42 = vmul.f32 1.442695, %v3471_v40  ;;  %v3458_v43 = vpop.xlane.xlu1 %3457 }
 0x3b9   : > { %4545 = vpow2.f32 %v3481_v41  ;;  %v3474_v44 = vsub.f32 %v4407_v25, %v3458_v43 }
 0x3ba   : > { %4547 = vpow2.f32 %v3479_v42 }
 0x3bb   : > { %v3485_v45 = vmul.f32 1.442695, %v3474_v44 }
 0x3bc   : > { %v3455_v46 = vpop.xlane.xlu1 %3454 }
 0x3bd   : > { %4549 = vpow2.f32 %v3485_v45  ;;  %v3473_v47 = vsub.f32 %v3210_v26, %v3455_v46  ;;  %v3461_v48 = vpop.xlane.xlu0 %3460 }
 0x3be   : > { %v3475_v49 = vsub.f32 %v3323_v29, %v3461_v48 }
 0x3bf   : > { %v3483_v50 = vmul.f32 1.442695, %v3473_v47 }
 0x3c0   : > { %v3487_v51 = vmul.f32 1.442695, %v3475_v49  ;;  %v3464_v52 = vpop.xlane.xlu1 %3463 }
 0x3c1   : > { %4551 = vpow2.f32 %v3483_v50  ;;  %v3476_v53 = vsub.f32 %v4412_v28, %v3464_v52  ;;  %v3904_v50 = vld [vmem:[%s274_s12 + $0x8] sm:$0x3f] }
 0x3c2   : > { %4553 = vpow2.f32 %v3487_v51 }
 0x3c3   : > { %v4546_v54 = vpop.eup %4545  ;;  %v3489_v55 = vmul.f32 1.442695, %v3476_v53 }
 0x3c4   : > { %v4548_v56 = vpop.eup %4547  ;;  %v3470_v57 = vpop.xlane.xlu1 %3469  ;;  %v3498_v58 = vsel %vm3449_vm3, %v4546_v54, 0.0 }
 0x3c5   : > { %4555 = vpow2.f32 %v3489_v55  ;;  %v3478_v59 = vsub.f32 %v4417_v33, %v3470_v57  ;;  %3499 = vadd.xlane.f32.xlu1 %v3498_v58  ;;  %v3467_v60 = vpop.xlane.xlu0 %3466  ;;  %v3495_v61 = vsel %vm3445_vm2, %v4548_v56, 0.0 }
 0x3c6   : > { %v3477_v62 = vsub.f32 %v3436_v34, %v3467_v60  ;;  %3496 = vadd.xlane.f32.xlu0 %v3495_v61 }
 0x3c7   : > { %v4550_v63 = vpop.eup %4549  ;;  %v3493_v0 = vmul.f32 1.442695, %v3478_v59 }
 0x3c8   : > { %v3491_v1 = vmul.f32 1.442695, %v3477_v62  ;;  %v3504_v2 = vsel %vm3449_vm3, %v4550_v63, 0.0 }
 0x3c9   : > { %4557 = vpow2.f32 %v3493_v0  ;;  %3505 = vadd.xlane.f32.xlu1 %v3504_v2 }
 0x3ca   : > { %4559 = vpow2.f32 %v3491_v1 }
 0x3cb   : > { %v4552_v3 = vpop.eup %4551 }
 0x3cc   : > { %v3501_v4 = vsel %vm3445_vm2, %v4552_v3, 0.0  ;;  %v4554_v5 = vpop.eup %4553 }
 0x3cd   : > { %3502 = vadd.xlane.f32.xlu0 %v3501_v4  ;;  %v3507_v9 = vsel %vm3445_vm2, %v4554_v5, 0.0 }
 0x3cf   : > { %v4556_v6 = vpop.eup %4555 }
 0x3d0   : > { %v3510_v7 = vsel %vm3449_vm3, %v4556_v6, 0.0 }
 0x3d1   : > { %3511 = vadd.xlane.f32.xlu1 %v3510_v7  ;;  %3508 = vadd.xlane.f32.xlu0 %v3507_v9 }
 0x3d3   : > { %v4558_v10 = vpop.eup %4557 }
 0x3d4   : > { %v4560_v12 = vpop.eup %4559  ;;  %v3516_v13 = vsel %vm3449_vm3, %v4558_v10, 0.0 }
 0x3d5   : > { %3517 = vadd.xlane.f32.xlu1 %v3516_v13  ;;  %v3513_v14 = vsel %vm3445_vm2, %v4560_v12, 0.0 }
 0x3d6   : > { %3514 = vadd.xlane.f32.xlu0 %v3513_v14 }
 0x452   : > { %v3500_v15 = vpop.xlane.xlu1 %3499 }
 0x453   : > { %4561 = vrcp.f32 %v3500_v15  ;;  %v3497_v16 = vpop.xlane.xlu0 %3496 }
 0x454   : > { %4563 = vrcp.f32 %v3497_v16 }
 0x456   : > { %v3506_v17 = vpop.xlane.xlu1 %3505 }
 0x457   : > { %4565 = vrcp.f32 %v3506_v17 }
 0x45a   : > { %v3503_v18 = vpop.xlane.xlu0 %3502 }
 0x45b   : > { %4567 = vrcp.f32 %v3503_v18  ;;  %v4115_v18 = vld [vmem:[%s5115_s3] ss:$0 sm:$0xff] }
 0x45d   : > { %v4562_v19 = vpop.eup %4561 }
 0x45e   : > { %v4564_v20 = vpop.eup %4563  ;;  %v3512_v21 = vpop.xlane.xlu1 %3511  ;;  %v3528_v24 = vmul.f32 %v4562_v19, %v4546_v54  ;;  %v3903_v54 = vld [vmem:[%s274_s12] sm:$0xff] }
 0x45f   : > { %v3509_v22 = vpop.xlane.xlu0 %3508  ;;  %4569 = vrcp.f32 %v3512_v21  ;;  %v3527_v23 = vmul.f32 %v4564_v20, %v4548_v56  ;;  %v4116_v21 = vld [vmem:[%s5116_s4] ss:$0 sm:$0xff] }
 0x460   : > { %4571 = vrcp.f32 %v3509_v22 }
 0x461   : > { %4420 = vmatprep.mubr.msk.f32.mxu0 %vm3445_vm2, %v3527_v23  ;;  %v4566_v27 = vpop.eup %4565 }
 0x462   : > { %v3518_v25 = vpop.xlane.xlu1 %3517  ;;  %4421 = vmatmul.mubr.msk.f32.vlgmr.msra.gmra.mrb[16].mxu0 %vm3445_vm2, %v3528_v24  ;;  %v3530_v30 = vmul.f32 %v4566_v27, %v4550_v63 }
 0x463   : > { %4573 = vrcp.f32 %v3518_v25  ;;  %4429 = vmatpush3.xpose.msk.msra.mxu0 %vm3445_vm2, %v5022_v8  ;;  %v3515_v26 = vpop.xlane.xlu0 %3514 }
 0x464   : > { %4575 = vrcp.f32 %v3515_v26 }
 0x465   : > { %v4568_v28 = vpop.eup %4567 }
 0x466   : > { %v3529_v29 = vmul.f32 %v4568_v28, %v4552_v3 }
 0x468   : > { %4425 = vmatprep.mubr.msk.f32.mxu1 %vm3445_vm2, %v3529_v29 }
 0x469   : > { %v4570_v31 = vpop.eup %4569  ;;  %4426 = vmatmul.mubr.msk.f32.vlgmr.msra.gmra.mrb[16].mxu1 %vm3445_vm2, %v3530_v30 }
 0x46a   : > { %v4572_v32 = vpop.eup %4571  ;;  %v3532_v33 = vmul.f32 %v4570_v31, %v4556_v6  ;;  %4434 = vmatpush3.xpose.msk.msra.mxu1 %vm3445_vm2, %v5024_v11 }
 0x46b   : > { %v3531_v34 = vmul.f32 %v4572_v32, %v4554_v5 }
 0x46d   : > { %v4574_v35 = vpop.eup %4573  ;;  %4430 = vmatprep.mubr.msk.f32.mxu0 %vm3445_vm2, %v3531_v34 }
 0x46e   : > { %v4576_v8 = vpop.eup %4575  ;;  %4431 = vmatmul.mubr.msk.f32.vlgmr.msra.gmra.mrb[18].mxu0 %vm3445_vm2, %v3532_v33  ;;  %v3534_v37 = vmul.f32 %v4574_v35, %v4558_v10 }
 0x46f   : > { %v3533_v36 = vmul.f32 %v4576_v8, %v4560_v12 }
 0x471   : > { %4435 = vmatprep.mubr.msk.f32.mxu1 %vm3445_vm2, %v3533_v36 }
 0x472   : > { %4436 = vmatmul.mubr.msk.f32.vlgmr.msra.gmra.mrb[18].mxu1 %vm3445_vm2, %v3534_v37 }
 0x535   : > { %v4422_v38 = vpop.f32.mrb[16].mxu0 }
 0x536   : > { %v3610_v39 = vpop.f32.mrb[17].mxu0 }
 0x53c   : > { %v4427_v40 = vpop.f32.mrb[16].mxu1 }
 0x53d   : > { %3875 = vrot.lane.b32.xlu1 %v4427_v40, %s4687_s14  ;;  %v3694_v11 = vpop.f32.mrb[17].mxu1 }
 0x53e   : > { %3873 = vrot.lane.b32.xlu0 %v3694_v11, %s4687_s14 }
 0x541   : > { %v4432_v41 = vpop.f32.mrb[18].mxu0 }
 0x542   : > { %v3778_v42 = vpop.f32.mrb[19].mxu0  ;;  %3883 = vrot.lane.b32.xlu0 %v4432_v41, %s4688_s15 }
 0x543   : > { %3881 = vrot.lane.b32.xlu1 %v3778_v42, %s4688_s15 }
 0x545   : > { %v4437_v43 = vpop.f32.mrb[18].mxu1 }
 0x546   : > { %3891 = vrot.lane.b32.xlu0 %v4437_v43, %s4689_s27  ;;  %v3862_v44 = vpop.f32.mrb[19].mxu1 }
 0x547   : > { %3889 = vrot.lane.b32.xlu1 %v3862_v44, %s4689_s27 }
 0x5af   : > { %v3876_v45 = vpop.permute.xlu1 %3875 }
 0x5b0   : > { %v3874_v46 = vpop.permute.xlu0 %3873  ;;  %v3896_v49 = vsel %vm324_vm1, %v4422_v38, %v3876_v45 }
 0x5b1   : > { %v3895_v51 = vsel %vm324_vm1, %v3610_v39, %v3874_v46 }
 0x5b4   : > { %v3884_v47 = vpop.permute.xlu0 %3883 }
 0x5b5   : > { %v3882_v48 = vpop.permute.xlu1 %3881  ;;  %v3899_v52 = vsel %vm3897_vm4, %v3896_v49, %v3884_v47 }
 0x5b6   : > { %v3898_v55 = vsel %vm3897_vm4, %v3895_v51, %v3882_v48 }
 0x5b8   : > { %v3892_v53 = vpop.permute.xlu0 %3891 }
 0x5b9   : > { %v3902_v56 = vsel %vm3900_vm5, %v3899_v52, %v3892_v53  ;;  %v3890_v57 = vpop.permute.xlu1 %3889 }
 0x5ba   : > { %v3901_v58 = vsel %vm3900_vm5, %v3898_v55, %v3890_v57  ;;  %v3906_v59 = vadd.f32 %v3904_v50, %v3902_v56 }
 0x5bb   : > { %v3905_v60 = vadd.f32 %v3903_v54, %v3901_v58 }
 0x5bc   : > { %v3912_v61 = vsel %vm3911_vm6, %v3906_v59, 0.0 }
 0x5bd   : > { %3913 = vadd.xlane.f32.xlu0 %v3912_v61  ;;  %v3908_v62 = vsel %vm3907_vm7, %v3905_v60, 0.0 }
 0x5be   : > { %3909 = vadd.xlane.f32.xlu1 %v3908_v62 }
 0x64a   : > { %v3914_v63 = vpop.xlane.xlu0 %3913 }
 0x64b   : > { %v3917_v0 = vmul.f32 0.03125, %v3914_v63  ;;  %v3910_v1 = vpop.xlane.xlu1 %3909 }
 0x64c   : > { %v3916_v2 = vmul.f32 0.03125, %v3910_v1 }
 0x64d   : > { %v3919_v3 = vsub.f32 %v3906_v59, %v3917_v0 }
 0x64e   : > { %v3918_v4 = vsub.f32 %v3905_v60, %v3916_v2 }
 0x64f   : > { %v3921_v5 = vmul.f32 %v3919_v3, %v3919_v3 }
 0x650   : > { %v3920_v6 = vmul.f32 %v3918_v4, %v3918_v4 }
 0x651   : > { %v3925_v7 = vsel %vm3911_vm6, %v3921_v5, 0.0 }
 0x652   : > { %3926 = vadd.xlane.f32.xlu1 %v3925_v7  ;;  %v3922_v9 = vsel %vm3907_vm7, %v3920_v6, 0.0 }
 0x653   : > { %3923 = vadd.xlane.f32.xlu0 %v3922_v9 }
 0x6df   : > { %v3927_v10 = vpop.xlane.xlu1 %3926 }
 0x6e0   : > { %v3929_v12 = vmul.f32 0.03125, %v3927_v10  ;;  %v3924_v13 = vpop.xlane.xlu0 %3923 }
 0x6e1   : > { %v3928_v14 = vmul.f32 0.03125, %v3924_v13 }
 0x6e2   : > { %v3931_v15 = vadd.f32 1e-05, %v3929_v12 }
 0x6e3   : > { %v3930_v16 = vadd.f32 1e-05, %v3928_v14 }
 0x6e4   : > { %4577 = vrsqrt.f32 %v3931_v15 }
 0x6e5   : > { %4579 = vrsqrt.f32 %v3930_v16 }
 0x6ee   : > { %v4578_v17 = vpop.eup %4577 }
 0x6ef   : > { %v4580_v19 = vpop.eup %4579  ;;  %v3935_v20 = vmul.f32 %v4578_v17, %v3919_v3 }
 0x6f0   : > { %v3934_v22 = vmul.f32 %v4580_v19, %v3918_v4 }
 0x6f1   : > { %v3944_v23 = vmul.f32 %v4115_v18, %v3935_v20 }
 0x6f2   : > { %v3943_v24 = vmul.f32 %v4115_v18, %v3934_v22 }
 0x6f3   : > { %v3953_v25 = vadd.f32 %v4116_v21, %v3944_v23 }
 0x6f4   : > { %v3952_v26 = vadd.f32 %v4116_v21, %v3943_v24 }
 0x6f5   : > { %3955 = vst.msk [vmem:[%s279_s8 + $0x8] sm:$0x3f] %vm3911_vm6, %v3953_v25 }
 0x6f6   : > { %3954 = vst.msk [vmem:[%s279_s8] sm:$0xff] %vm3907_vm7, %v3952_v26 }
 0x6f7 PF: > { %s5129_s9 = smov %s4793_s18  ;;  %p16_p1 = scmp.ge.s32.totalorder %s4764_s28, 6  }
 0x6f8   : > { %s5130_s18 = smov %s4669_s19  ;;  %s5131_s19 = smov %s4673_s20 }
 0x6f9   : > { %s5132_s20 = smov %s5129_s9  ;;  %s5133_s21 = smov %s4764_s28 }
 0x6fa   :  { %18 = sbr.rel (!%p16_p1) target bundleno = 4 (0x4), region = 87 }
 0x701   :  { %3977 = vsyncpa [#allocation3], 1 }
 0x702   :  { %3979 = vsyncpa [#allocation3 + $0x1], 1 }
 0x703   :  { %3980 = vsyncpa [#allocation5], 1 }

</bundles_post_ra>
